<compile_context>
chip_gen: v7x
topology: tpu7x:2x2x1
jax: 0.10.0
libtpu: 0.0.40
codegen_flags: <defaults>
</compile_context>

<pallas_src>
import math

import jax
import jax.numpy as jnp
from jax.experimental import pallas as pl
from jax.experimental.pallas import tpu as pltpu

_LOG2 = math.log(2.0)
_MAX_LANES = 1024                      # lane-dense last dim cap (multiple of 128)
_TARGET_BLOCK_BYTES = 4 * 1024 * 1024  # ~4 MiB per block per array


def _make_kernel(alpha: float, beta: float):
    """Build the elementwise kernel with alpha/beta resolved at trace time."""
    if beta != 0.0:
        scale = alpha / beta

        def kernel(x_ref, o_ref):
            x = x_ref[...].astype(jnp.float32)
            # softplus(beta*x) = logaddexp(beta*x, 0): one exp + one log per elem (EUP).
            sp = jnp.logaddexp(beta * x, jnp.float32(0.0))
            o_ref[...] = (scale * (sp - _LOG2)).astype(o_ref.dtype)

    else:
        half_alpha = 0.5 * alpha

        def kernel(x_ref, o_ref):
            x = x_ref[...].astype(jnp.float32)
            o_ref[...] = (half_alpha * x).astype(o_ref.dtype)

    return kernel


def _choose_layout(n: int, itemsize: int):
    """Pick a lane-dense 2-D layout (rows, lanes), padding, row-block tm, grid size."""
    # lanes: largest multiple of 128 (<= _MAX_LANES) that divides n; fallback 128.
    lanes = 128
    if n % 128 == 0:
        for cand in range(_MAX_LANES, 127, -128):
            if n % cand == 0:
                lanes = cand
                break
        rows = n // lanes
        pad = 0
    else:
        rows = pl.cdiv(n, lanes)
        pad = rows * lanes - n  # < 128 padded elements (rare path)

    # Sublane multiple by dtype packing (8 for f32, 16 for bf16, 32 for int8/fp8).
    sub = max(8, 32 // itemsize)

    # Byte-sized row block: target ~_TARGET_BLOCK_BYTES per block, sublane-aligned.
    tm_cap = max(sub, (_TARGET_BLOCK_BYTES // (lanes * itemsize)) // sub * sub)

    if rows >= 2 * sub:
        # Ensure up to 4 evenly sized blocks so v7x's two TensorCores both get work.
        n_blocks = min(4, rows // sub)
        tm_balance = pl.cdiv(pl.cdiv(rows, n_blocks), sub) * sub
        tm = max(sub, min(tm_cap, tm_balance))
    else:
        tm = rows  # single block; tm == full rows dim is layout-legal

    grid = pl.cdiv(rows, tm)
    return lanes, rows, pad, tm, grid


def shifted_softplus(x: jax.Array, alpha: float = 1.0, beta: float = 1.0) -> jax.Array:
    """Apply ShiftedSoftplus elementwise via a tiled, pipelined Pallas TPU kernel.

    x: any-shape float array (the module uses [:, num_features]).
    alpha, beta: static scalar parameters (non-trainable buffers in the module).
    """
    # TODO(synk): trainable (learnable) alpha/beta would need runtime scalar inputs
    # (SMEM scalars); the non-trainable buffer case folds them at trace time.
    orig_shape = x.shape
    dtype = x.dtype
    itemsize = jnp.dtype(dtype).itemsize
    n = x.size

    lanes, rows, pad, tm, grid = _choose_layout(n, itemsize)

    flat = x.reshape(-1)                       # row-major reshape: free (bitcast)
    if pad:
        flat = jnp.pad(flat, (0, pad))         # only when n % 128 != 0 (<128 elems)
    x2d = flat.reshape(rows, lanes)

    block_bytes = tm * lanes * itemsize
    # in + out, double-buffered, plus headroom; portable across v5e/v6e/v7x defaults.
    vmem_limit = max(32 * 1024 * 1024, int(4 * block_bytes * 1.25) + (1 << 20))

    out2d = pl.pallas_call(
        _make_kernel(float(alpha), float(beta)),
        out_shape=jax.ShapeDtypeStruct((rows, lanes), dtype),
        grid=(grid,),
        in_specs=[pl.BlockSpec((tm, lanes), lambda i: (i, 0))],
        out_specs=pl.BlockSpec((tm, lanes), lambda i: (i, 0)),
        compiler_params=pltpu.CompilerParams(
            dimension_semantics=("parallel",),   # shard row-blocks over both TCs (v7x)
            vmem_limit_bytes=vmem_limit,
        ),
        cost_estimate=pl.CostEstimate(
            flops=6 * n, transcendentals=2 * n, bytes_accessed=2 * n * itemsize),
    )(x2d)

    out = out2d.reshape(-1)
    if pad:
        out = out[:n]
    return out.reshape(orig_shape)


def _reference(x, alpha=1.0, beta=1.0):
    x32 = x.astype(jnp.float32)
    if beta != 0.0:
        y = alpha * (jnp.logaddexp(beta * x32, 0.0) - _LOG2) / beta
    else:
        y = alpha * 0.5 * x32
    return y.astype(x.dtype)


if __name__ == "__main__":
    key = jax.random.PRNGKey(0)

    # Small shape matching the module's [:, num_features] convention.
    N, F = 8, 32
    x = jax.random.normal(key, (N, F), dtype=jnp.float32)

    initial_alpha, initial_beta = 1.0, 1.0
    y = jax.block_until_ready(shifted_softplus(x, initial_alpha, initial_beta))
    y_ref = _reference(x, initial_alpha, initial_beta)
    assert y.shape == x.shape and y.dtype == x.dtype
    assert jnp.allclose(y, y_ref, atol=1e-5, rtol=1e-5), "mismatch vs reference"

    # beta == 0 branch (identity limit): alpha=2, beta=0 -> f(x) = x.
    y0 = jax.block_until_ready(shifted_softplus(x, alpha=2.0, beta=0.0))
    assert jnp.allclose(y0, x, atol=1e-6), "beta=0 branch mismatch"

    # n divisible by 128 but not by 1024: exact layout, no padding, no slicing.
    k2 = jax.random.PRNGKey(1)
    x2 = jax.random.normal(k2, (128, 96), dtype=jnp.float32)
    y2 = jax.block_until_ready(shifted_softplus(x2, 1.3, 0.7))
    assert jnp.allclose(y2, _reference(x2, 1.3, 0.7), atol=1e-5, rtol=1e-5), \
        "non-1024-divisible path mismatch"

    # n NOT divisible by 128: exercises the (rare, <128-element) padding path.
    k3 = jax.random.PRNGKey(2)
    x3 = jax.random.normal(k3, (10, 30), dtype=jnp.float32)
    y3 = jax.block_until_ready(shifted_softplus(x3, 0.9, 1.7))
    assert jnp.allclose(y3, _reference(x3, 0.9, 1.7), atol=1e-5, rtol=1e-5), \
        "padded-tail path mismatch"

    # Multi-block grid (megacore-balanced) path, still small.
    k4 = jax.random.PRNGKey(3)
    x4 = jax.random.normal(k4, (256, 128), dtype=jnp.float32)
    y4 = jax.block_until_ready(shifted_softplus(x4, 1.1, 2.0))
    assert jnp.allclose(y4, _reference(x4, 1.1, 2.0), atol=1e-5, rtol=1e-5), \
        "multi-block path mismatch"

    # bf16 input: HBM traffic stays bf16, compute in f32 inside the kernel.
    x5 = jax.random.normal(jax.random.PRNGKey(4), (64, 128), dtype=jnp.bfloat16)
    y5 = jax.block_until_ready(shifted_softplus(x5, 1.0, 1.0))
    assert y5.dtype == jnp.bfloat16
    assert jnp.allclose(y5.astype(jnp.float32),
                        _reference(x5, 1.0, 1.0).astype(jnp.float32),
                        atol=2e-2, rtol=2e-2), "bf16 path mismatch"

    print("KERNEL_OK")
</pallas_src>

<mosaic_0001>
module attributes {stable_mosaic.version = 11 : i64} {
  func.func @kernel(%arg0: i32, %arg1: memref<1x256xf32, #tpu.memory_space<vmem>>, %arg2: memref<1x256xf32, #tpu.memory_space<vmem>>) attributes {dimension_semantics = [#tpu.dimension_semantics<parallel>], iteration_bounds = array<i64: 1>, scalar_prefetch = 0 : i64, scratch_operands = 0 : i64, tpu.core_type = #tpu.core_type<tc>, window_params = [{transform_indices = @transform_0, window_bounds = array<i64: 1, 256>}, {transform_indices = @transform_1, window_bounds = array<i64: 1, 256>}]} {
    %c0 = arith.constant 0 : index
    %c0_0 = arith.constant 0 : index
    %0 = vector.load %arg1[%c0, %c0_0] : memref<1x256xf32, #tpu.memory_space<vmem>>, vector<1x256xf32>
    %cst = arith.constant 1.000000e+00 : f32
    %1 = vector.broadcast %cst : f32 to vector<1x256xf32>
    %2 = arith.mulf %1, %0 : vector<1x256xf32>
    %cst_1 = arith.constant 0.000000e+00 : f32
    %3 = vector.broadcast %cst_1 : f32 to vector<1x256xf32>
    %4 = arith.maximumf %2, %3 : vector<1x256xf32>
    %5 = vector.broadcast %cst_1 : f32 to vector<1x256xf32>
    %6 = arith.subf %2, %5 : vector<1x256xf32>
    %7 = arith.cmpf one, %6, %6 : vector<1x256xf32>
    %8 = vector.broadcast %cst_1 : f32 to vector<1x256xf32>
    %9 = arith.addf %2, %8 : vector<1x256xf32>
    %10 = math.absf %6 : vector<1x256xf32>
    %cst_2 = arith.constant 0.000000e+00 : f32
    %11 = vector.broadcast %cst_2 : f32 to vector<1x256xf32>
    %12 = arith.subf %11, %10 : vector<1x256xf32>
    %13 = math.exp %12 : vector<1x256xf32>
    %14 = math.log1p %13 : vector<1x256xf32>
    %15 = arith.addf %4, %14 : vector<1x256xf32>
    %16 = arith.select %7, %9, %15 : vector<1x256xi1>, vector<1x256xf32>
    %cst_3 = arith.constant 0.693147182 : f32
    %17 = vector.broadcast %cst_3 : f32 to vector<1x256xf32>
    %18 = arith.subf %16, %17 : vector<1x256xf32>
    %cst_4 = arith.constant 1.000000e+00 : f32
    %19 = vector.broadcast %cst_4 : f32 to vector<1x256xf32>
    %20 = arith.mulf %19, %18 : vector<1x256xf32>
    %c0_5 = arith.constant 0 : index
    %c0_6 = arith.constant 0 : index
    %21 = vector.load %arg2[%c0_5, %c0_6] : memref<1x256xf32, #tpu.memory_space<vmem>>, vector<1x256xf32>
    tpu.vector_store %arg2[%c0_5, %c0_6], %20 {strides = array<i32>} : memref<1x256xf32, #tpu.memory_space<vmem>>, vector<1x256xf32>,
    return
  }
  func.func @transform_0(%arg0: i32) -> (i32, i32) {
    %c0_i32 = arith.constant 0 : i32
    %c0_i32_0 = arith.constant 0 : i32
    return %arg0, %c0_i32 : i32, i32
  }
  func.func @transform_1(%arg0: i32) -> (i32, i32) {
    %c0_i32 = arith.constant 0 : i32
    %c0_i32_0 = arith.constant 0 : i32
    return %arg0, %c0_i32 : i32, i32
  }
}

</mosaic_0001>

<bundles_post_ra>
// kernel: tpu_custom_call.1
= control target key start
LH: loop header
LB: loop body
LE: loop exit
PB: predicated region body
PF: predicated region fallthrough
CT: control target
= control target key end

     0   :  { %6 = vsyncpa [#allocation3], 0  ;;  %s152_s0 = inlined_call_operand.hbm [shape: f32[1,256], index: 0, kind: input, shape index: {}]   ;;  %s153_s1 = inlined_call_operand.hbm [shape: f32[1,256], index: 1, kind: output, shape index: {}]  }
   0x1   :  { %7 = vsyncpa [#allocation4], 0  ;;  %s116_s6 = smov [#allocation2]   ;;  %s68_s10 = scalar_lea.hbm %s152_s0, 32 }
   0x2   :  { %s14_s7 = sshll.u32 %s116_s6, 4  ;;  %p69_p0 = scmp.ne.s32.totalorder %s152_s0, %s68_s10  ;;  %s15_s7 = int_to_ptr.vmem [resolvable:$true] %s14_s7 }
   0x3   :  { %p72_p1 = scmp.lt.u32.totalorder %s68_s10, %s152_s0 }
   0x5   :  { %p74_p2 = pnand %p72_p1, %p69_p0 }
   0x7   :  { %77 = shalt.err (!%p74_p2)
}
   0x8   :  { %s78_s15 = scalar_lea.vmem %s15_s7, 32  ;;  %p83_p4 = scmp.lt.s32.totalorder %s15_s7, %s15_s7 }
   0x9   :  { %p79_p3 = scmp.ne.s32.totalorder %s15_s7, %s78_s15  ;;  %p84_p5 = scmp.lt.s32.totalorder %s78_s15, %s78_s15 }
   0xb   :  { %p85_p6 = por %p84_p5, %p83_p4 }
   0xd   :  { %p86_p7 = pnand %p85_p6, %p79_p3 }
   0xf   :  { %89 = shalt.err (!%p86_p7)
}
  0x10   :  { %17 = dma.hbm_to_vmem [thread:$0]  %s152_s0, 32, %s15_s7, [#allocation3]  }
  0x11   :  { %112 = dma.done.wait [#allocation3], 32  }
  0x12   :  { %113 = vsyncadd [#allocation3], 4294967264  ;;  %v21_v0 = vld [vmem:[#allocation2] sm:$0x3]  ;;  %v41_v13 = vlaneseq  ;;  %s117_s0 = smov [#allocation5]  }
  0x13   :  { %v25_v1 = vand.u32 2147483647, %v21_v0  ;;  %v22_v11 = vmax.f32 %v21_v0, 0.0  ;;  %vm23_vm1 = vcmp.ne.f32.partialorder %v21_v0, %v21_v0  ;;  %s52_s18 = sshll.u32 %s117_s0, 4  ;;  %s53_s18 = int_to_ptr.vmem [resolvable:$true] %s52_s18 }
  0x14   :  { %vm43_vm2 = vcmp.lt.s32.totalorder %v41_v13, 256  ;;  %s90_s19 = scalar_lea.vmem %s53_s18, 32  ;;  %p95_p9 = scmp.lt.s32.totalorder %s53_s18, %s53_s18 }
  0x15   :  { %v26_v2 = vsub.f32 0.0, %v25_v1  ;;  %p91_p8 = scmp.ne.s32.totalorder %s53_s18, %s90_s19  ;;  %p96_p10 = scmp.lt.s32.totalorder %s90_s19, %s90_s19 }
  0x17   :  { %v27_v3 = vmul.f32 1.442695, %v26_v2  ;;  %p97_p11 = por %p96_p10, %p95_p9 }
  0x19   :  { %64 = vpow2.f32 %v27_v3  ;;  %p98_p12 = pnand %p97_p11, %p91_p8 }
  0x23   :  { %v65_v4 = vpop.eup %64 }
  0x24   :  { %v29_v5 = vadd.f32 1.0, %v65_v4  ;;  %v32_v6 = vmul.f32 -0.5, %v65_v4  ;;  %v35_v8 = vand.u32 2147483647, %v65_v4 }
  0x26   :  { %66 = vlog2.f32 %v29_v5  ;;  %v33_v7 = vadd.f32 1.0, %v32_v6  ;;  %vm36_vm0 = vcmp.lt.f32.partialorder %v35_v8, 0.0004427343 }
  0x28   :  { %v34_v9 = vmul.f32 %v65_v4, %v33_v7 }
  0x30   :  { %v67_v10 = vpop.eup %66 }
  0x31   :  { %v31_v12 = vmul.f32 0.6931472, %v67_v10 }
  0x33   :  { %v37_v14 = vsel %vm36_vm0, %v34_v9, %v31_v12 }
  0x34   :  { %v38_v15 = vadd.f32 %v37_v14, %v22_v11 }
  0x36   :  { %v39_v16 = vsel %vm23_vm1, %v21_v0, %v38_v15 }
  0x37   :  { %v61_v17 = vadd.f32 -0.6931472, %v39_v16 }
  0x39   :  { %45 = vst.msk [vmem:[#allocation5] sm:$0x3] %vm43_vm2, %v61_v17 }
  0x3a   :  { %101 = shalt.err (!%p98_p12)
}
  0x3b   :  { %s102_s22 = scalar_lea.hbm %s153_s1, 32 }
  0x3c   :  { %p103_p13 = scmp.ne.s32.totalorder %s153_s1, %s102_s22  ;;  %p106_p0 = scmp.lt.u32.totalorder %s102_s22, %s153_s1 }
  0x3e   :  { %p108_p1 = pnand %p106_p0, %p103_p13 }
  0x40   :  { %111 = shalt.err (!%p108_p1)
}
  0x41   :  { %55 = dma.vmem_to_hbm [thread:$0]  %s53_s18, 32, %s153_s1, [#allocation4]  }
  0x42   :  { %114 = dma.done.wait [#allocation4], 32  }
  0x43   :  { %115 = vsyncadd [#allocation4], 4294967264 }
  0x44   :  { %59 = vsyncpa [#allocation3], 1 }
  0x45   :  { %60 = vsyncpa [#allocation4], 1 }

</bundles_post_ra>
